<compile_context>
chip_gen: v7x
topology: tpu7x:2x2x1
jax: 0.10.0
libtpu: 0.0.40
codegen_flags: <defaults>
</compile_context>

<pallas_src>
import functools

import jax
import jax.numpy as jnp
from jax.experimental import pallas as pl
from jax.experimental.pallas import tpu as pltpu

_EPS = 1e-5


def _layernorm_kernel(x_ref, w_ref, *rest, c_valid, lane_padded):
    """rest = (b_ref, o_ref) when bias is present, else (o_ref,)."""
    if len(rest) == 2:
        b_ref, o_ref = rest
    else:
        b_ref = None
        (o_ref,) = rest

    x = x_ref[...].astype(jnp.float32)            # (tm, c_padded)

    mean = jnp.sum(x, axis=-1, keepdims=True) / c_valid
    xc = x - mean

    if lane_padded:
        # Padded lanes are zero host-side, so sum(x) and sum(x*x) are exact
        # without any mask/iota.  One-pass variance (clamped against tiny
        # negative values from cancellation; accumulation stays in f32).
        sumsq = jnp.sum(x * x, axis=-1, keepdims=True)
        var = jnp.maximum(sumsq / c_valid - mean * mean, 0.0)
    else:
        # Exact feature width: keep the numerically safer two-pass form.
        var = jnp.sum(xc * xc, axis=-1, keepdims=True) / c_valid

    inv = jax.lax.rsqrt(var + _EPS)               # EUP slot; effectively free

    y = (xc * inv) * w_ref[...].astype(jnp.float32)
    if b_ref is not None:
        y = y + b_ref[...].astype(jnp.float32)

    o_ref[...] = y.astype(o_ref.dtype)


def _round_up(n, m):
    return ((n + m - 1) // m) * m


def _sublane_pack(dtype):
    # f32 -> 8, bf16/f16 -> 16, int8/fp8 -> 32 sublanes per vreg.
    return max(8, 32 // jnp.dtype(dtype).itemsize)


def _vmem_budget():
    """(working_budget_bytes, vmem_limit_bytes) per generation."""
    try:
        cap = pltpu.get_tpu_info().vmem_capacity_bytes
    except Exception:
        cap = 64 * 1024 * 1024                    # conservative fallback (v7x-sized)
    if cap >= 100 * 1024 * 1024:                  # v5e / v6e: 128 MiB VMEM
        return 64 * 1024 * 1024, 100 * 1024 * 1024
    # v7x: 64 MiB VMEM per TensorCore -> leave headroom for the compiler.
    return 30 * 1024 * 1024, 44 * 1024 * 1024


def _choose_tm(rows, c_padded, itemsize, pack, budget_bytes):
    # Per-row VMEM cost: double-buffered in + out pipeline buffers in the input
    # dtype (4 * cp * itemsize) PLUS ~3 live (tm, cp) float32 intermediates
    # inside the body (x upcast, xc, y / x*x).
    bytes_per_row = 4 * c_padded * itemsize + 3 * c_padded * 4
    cap = budget_bytes // max(bytes_per_row, 1)
    cap = max(pack, (cap // pack) * pack)
    cap = min(cap, 2048)                          # diminishing returns past ~MiB tiles
    # Keep >= ~8 grid steps (>= 4 per TensorCore on v7x megacore) so the
    # read/compute/write pipeline stays full and both cores get balanced work.
    target = _round_up(max((rows + 7) // 8, 1), pack)
    return max(min(cap, target), pack)


def layer_norm(x, weight, bias=None):
    """LayerNorm over the last axis of x (F.layer_norm(input, (C,), w, b, 1e-5))."""
    orig_shape = x.shape
    c = orig_shape[-1]
    rows = 1
    for d in orig_shape[:-1]:
        rows *= d

    itemsize = jnp.dtype(x.dtype).itemsize
    pack = _sublane_pack(x.dtype)

    c_padded = _round_up(c, 128)                  # lane-dense stores
    lane_padded = c_padded != c

    budget_bytes, vmem_limit = _vmem_budget()
    tm = _choose_tm(rows, c_padded, itemsize, pack, budget_bytes)
    num_steps = (rows + tm - 1) // tm             # partial last block; OOB rows' writes dropped

    x2 = x.reshape(rows, c)
    if lane_padded:
        # Only the feature axis is padded (rare: transformer widths are already
        # multiples of 128).  Rows are NOT padded/sliced -> no extra HBM passes.
        x2 = jnp.pad(x2, ((0, 0), (0, c_padded - c)))

    w2 = weight.reshape(1, c)
    if lane_padded:
        w2 = jnp.pad(w2, ((0, 0), (0, c_padded - c)))

    has_bias = bias is not None
    inputs = [x2, w2]
    in_specs = [
        pl.BlockSpec((tm, c_padded), lambda i: (i, 0)),   # x row tile
        pl.BlockSpec((1, c_padded), lambda i: (0, 0)),    # weight (resident)
        # NOTE: pl.Buffered(3) on x could hide exposed DMA on 128 MiB parts for
        # very long grids; left at the default 2-deep pipeline (review: only
        # apply if profiling shows exposed input DMA, never on v7x).
    ]
    if has_bias:
        b2 = bias.reshape(1, c)
        if lane_padded:
            b2 = jnp.pad(b2, ((0, 0), (0, c_padded - c)))
        inputs.append(b2)
        in_specs.append(pl.BlockSpec((1, c_padded), lambda i: (0, 0)))

    kernel = functools.partial(_layernorm_kernel, c_valid=c, lane_padded=lane_padded)

    cost = pl.CostEstimate(
        flops=10 * rows * c_padded,
        transcendentals=rows,                     # one rsqrt per row
        bytes_accessed=2 * rows * c_padded * itemsize
        + (2 if has_bias else 1) * c_padded * itemsize,
    )

    out = pl.pallas_call(
        kernel,
        out_shape=jax.ShapeDtypeStruct((rows, c_padded), x.dtype),
        grid_spec=pltpu.PrefetchScalarGridSpec(
            num_scalar_prefetch=0,
            grid=(num_steps,),
            in_specs=in_specs,
            out_specs=pl.BlockSpec((tm, c_padded), lambda i: (i, 0)),
        ),
        compiler_params=pltpu.CompilerParams(
            dimension_semantics=("parallel",),    # v7x megacore shards row tiles
            vmem_limit_bytes=vmem_limit,
        ),
        cost_estimate=cost,
    )(*inputs)

    if lane_padded:
        out = out[:, :c]
    return out.reshape(orig_shape)


if __name__ == "__main__":
    key = jax.random.PRNGKey(0)
    B, T, C = 2, 8, 32  # batch=2, seq=8, hidden=32 (small demo shape)

    x = jax.random.normal(key, (B, T, C), dtype=jnp.float32)

    # Parameters exactly as the PyTorch module's __init__ (bias=True case):
    weight = jnp.ones((C,), dtype=jnp.float32)
    bias = jnp.zeros((C,), dtype=jnp.float32)

    y = layer_norm(x, weight, bias)
    y = jax.block_until_ready(y)

    # Also exercise the bias=False path (module with bias=False -> bias is None).
    y_nb = jax.block_until_ready(layer_norm(x, weight, None))

    # Reference check in plain JAX (same math as F.layer_norm, eps=1e-5).
    mean = jnp.mean(x, axis=-1, keepdims=True)
    var = jnp.mean((x - mean) ** 2, axis=-1, keepdims=True)
    ref = (x - mean) * jax.lax.rsqrt(var + 1e-5) * weight + bias
    ref_nb = (x - mean) * jax.lax.rsqrt(var + 1e-5) * weight

    assert jnp.allclose(y, ref, atol=1e-5, rtol=1e-5), "mismatch vs reference (bias)"
    assert jnp.allclose(y_nb, ref_nb, atol=1e-5, rtol=1e-5), "mismatch vs reference (no bias)"

    print("KERNEL_OK")
</pallas_src>

<mosaic_0001>
module attributes {stable_mosaic.version = 11 : i64} {
  func.func @_layernorm_kernel(%arg0: i32, %arg1: memref<8x128xf32, #tpu.memory_space<vmem>>, %arg2: memref<1x128xf32, #tpu.memory_space<vmem>>, %arg3: memref<1x128xf32, #tpu.memory_space<vmem>>, %arg4: memref<8x128xf32, #tpu.memory_space<vmem>>) attributes {dimension_semantics = [#tpu.dimension_semantics<parallel>], iteration_bounds = array<i64: 2>, scalar_prefetch = 0 : i64, scratch_operands = 0 : i64, tpu.core_type = #tpu.core_type<tc>, window_params = [{transform_indices = @transform_0, window_bounds = array<i64: 8, 128>}, {pipeline_mode = #tpu.pipeline_mode<synchronous>, transform_indices = @transform_1, window_bounds = array<i64: 1, 128>}, {pipeline_mode = #tpu.pipeline_mode<synchronous>, transform_indices = @transform_2, window_bounds = array<i64: 1, 128>}, {transform_indices = @transform_3, window_bounds = array<i64: 8, 128>}]} {
    %c0 = arith.constant 0 : index
    %c0_0 = arith.constant 0 : index
    %0 = vector.load %arg1[%c0, %c0_0] : memref<8x128xf32, #tpu.memory_space<vmem>>, vector<8x128xf32>
    %cst = arith.constant dense<0.000000e+00> : vector<8xf32>
    %1 = vector.multi_reduction <add>, %0, %cst [1] : vector<8x128xf32> to vector<8xf32>
    %2 = vector.shape_cast %1 : vector<8xf32> to vector<8x1xf32>
    %cst_1 = arith.constant 3.200000e+01 : f32
    %3 = vector.broadcast %cst_1 : f32 to vector<8x1xf32>
    %4 = arith.divf %2, %3 : vector<8x1xf32>
    %5 = vector.broadcast %4 : vector<8x1xf32> to vector<8x128xf32>
    %6 = arith.subf %0, %5 : vector<8x128xf32>
    %7 = arith.mulf %0, %0 : vector<8x128xf32>
    %cst_2 = arith.constant dense<0.000000e+00> : vector<8xf32>
    %8 = vector.multi_reduction <add>, %7, %cst_2 [1] : vector<8x128xf32> to vector<8xf32>
    %9 = vector.shape_cast %8 : vector<8xf32> to vector<8x1xf32>
    %cst_3 = arith.constant 3.200000e+01 : f32
    %10 = vector.broadcast %cst_3 : f32 to vector<8x1xf32>
    %11 = arith.divf %9, %10 : vector<8x1xf32>
    %12 = arith.mulf %4, %4 : vector<8x1xf32>
    %13 = arith.subf %11, %12 : vector<8x1xf32>
    %cst_4 = arith.constant 0.000000e+00 : f32
    %14 = vector.broadcast %cst_4 : f32 to vector<8x1xf32>
    %15 = arith.maximumf %13, %14 : vector<8x1xf32>
    %cst_5 = arith.constant 9.99999974E-6 : f32
    %16 = vector.broadcast %cst_5 : f32 to vector<8x1xf32>
    %17 = arith.addf %15, %16 : vector<8x1xf32>
    %18 = math.rsqrt %17 : vector<8x1xf32>
    %19 = vector.broadcast %18 : vector<8x1xf32> to vector<8x128xf32>
    %20 = arith.mulf %6, %19 : vector<8x128xf32>
    %c0_6 = arith.constant 0 : index
    %c0_7 = arith.constant 0 : index
    %21 = vector.load %arg2[%c0_6, %c0_7] : memref<1x128xf32, #tpu.memory_space<vmem>>, vector<1x128xf32>
    %22 = vector.broadcast %21 : vector<1x128xf32> to vector<8x128xf32>
    %23 = arith.mulf %20, %22 : vector<8x128xf32>
    %c0_8 = arith.constant 0 : index
    %c0_9 = arith.constant 0 : index
    %24 = vector.load %arg3[%c0_8, %c0_9] : memref<1x128xf32, #tpu.memory_space<vmem>>, vector<1x128xf32>
    %25 = vector.broadcast %24 : vector<1x128xf32> to vector<8x128xf32>
    %26 = arith.addf %23, %25 : vector<8x128xf32>
    %c0_10 = arith.constant 0 : index
    %c0_11 = arith.constant 0 : index
    %27 = vector.load %arg4[%c0_10, %c0_11] : memref<8x128xf32, #tpu.memory_space<vmem>>, vector<8x128xf32>
    tpu.vector_store %arg4[%c0_10, %c0_11], %26 {strides = array<i32>} : memref<8x128xf32, #tpu.memory_space<vmem>>, vector<8x128xf32>,
    return
  }
  func.func @transform_0(%arg0: i32) -> (i32, i32) {
    %c0_i32 = arith.constant 0 : i32
    %c0_i32_0 = arith.constant 0 : i32
    return %arg0, %c0_i32 : i32, i32
  }
  func.func @transform_1(%arg0: i32) -> (i32, i32) {
    %c0_i32 = arith.constant 0 : i32
    %c0_i32_0 = arith.constant 0 : i32
    %c0_i32_1 = arith.constant 0 : i32
    return %c0_i32, %c0_i32_0 : i32, i32
  }
  func.func @transform_2(%arg0: i32) -> (i32, i32) {
    %c0_i32 = arith.constant 0 : i32
    %c0_i32_0 = arith.constant 0 : i32
    %c0_i32_1 = arith.constant 0 : i32
    return %c0_i32, %c0_i32_0 : i32, i32
  }
  func.func @transform_3(%arg0: i32) -> (i32, i32) {
    %c0_i32 = arith.constant 0 : i32
    %c0_i32_0 = arith.constant 0 : i32
    return %arg0, %c0_i32 : i32, i32
  }
}

</mosaic_0001>

<bundles_post_ra>
// kernel: tpu_custom_call.1
= control target key start
LH: loop header
LB: loop body
LE: loop exit
PB: predicated region body
PF: predicated region fallthrough
CT: control target
= control target key end

     0   :  { %8 = vsyncpa [#allocation3], 0  ;;  %s652_s0 = inlined_call_operand.hbm [shape: f32[16,128], index: 0, kind: input, shape index: {}]   ;;  %s653_s1 = inlined_call_operand.vmem [shape: f32[1,128], index: 1, kind: input, shape index: {}]   ;;  %s654_s2 = inlined_call_operand.vmem [shape: f32[1,128], index: 2, kind: input, shape index: {}]   ;;  %s655_s3 = inlined_call_operand.hbm [shape: f32[16,128], index: 3, kind: output, shape index: {}]  }
   0x1   :  { %10 = vsyncpa [#allocation3 + $0x1], 0 }
   0x2   :  { %11 = vsyncpa [#allocation4], 0 }
   0x3   :  { %13 = vsyncpa [#allocation4 + $0x1], 0  ;;  %s485_s12 = smov 0   ;;  %s487_s13 = smov 0  }
   0x4   :  { %s489_s14 = smov 0   ;;  %s491_s15 = smov 0  }
   0x5 LB: > { %s506_s16 = sadd.s32 4294967295, %s461_s15   ;;  %s303_s17 = sadd.s32 4294967294, %s461_s15   ;;  %s461_s15 = sphi %s491_s15, %s670_s15   ;;  %s457_s14 = sphi %s489_s14, %s669_s14   ;;  %s453_s13 = sphi %s487_s13, %s668_s13   ;;  %s449_s12 = sphi %s485_s12, %s667_s12  }
   0x6   : > { %s510_s18 = sadd.s32 1, %s461_s15   ;;  %s26_s19 = sadd.s32 1, %s457_s14 }
   0x7   : > { %s23_s20 = ssub.s32 %s461_s15, %s510_s18  ;;  %p33_p0 = scmp.ne.s32.totalorder %s457_s14, %s453_s13 }
   0x8   : > { %p24_p1 = scmp.eq.s32.totalorder %s23_s20, 0  ;;  %p34_p2 = scmp.eq.s32.totalorder %s461_s15, 0 }
   0x9   : > { %p39_p3 = scmp.ne.s32.totalorder %s453_s13, %s449_s12  ;;  %p40_p4 = scmp.eq.s32.totalorder %s506_s16, 0 }
   0xa   : > { %s522_s21 = scalar_select %p24_p1, %s457_s14, %s26_s19  }
   0xb   : > { %p524_p5 = por %p34_p2, %p33_p0  ;;  %p528_p6 = por %p40_p4, %p39_p3 }
   0xc   : > { %p105_p7 = scmp.eq.s32.totalorder %s506_s16, 1  ;;  %p111_p8 = scmp.eq.s32.totalorder %s303_s17, 1 }
   0xd   : > { %p329_p10 = scmp.lt.s32.totalorder %s461_s15, 2  ;;  %s137_s26 = sand.u32 1, %s457_s14  }
   0xe   : > { %p535_p11 = por %p105_p7, %p33_p0  ;;  %p539_p12 = por %p111_p8, %p39_p3 }
   0xf   : > { %s307_s27 = sshll.u32 %s461_s15, 7  ;;  %s306_s28 = sshll.u32 %s137_s26, 3 }
  0x10   : > { %s659_s24 = scalar_select %p535_p11, 1, 0 }
  0x11   : > { %s660_s25 = scalar_select %p539_p12, 1, 0 }
  0x12   : > { %s548_s4 = scalar_lea.hbm %s652_s0, %s307_s27  ;;  %s141_s5 = scalar_lea.vmem [#allocation2], %s306_s28 }
  0x13   : > { %s148_s6 = sshll.u32 %s141_s5, 4  ;;  %p552_p13 = pnand %p329_p10, %p524_p5  ;;  %s556_s6 = int_to_ptr.vmem [resolvable:$true] %s148_s6 }
  0x14   : > { %s138_s8 = scalar_lea.sflag [#allocation3], %s137_s26  ;;  %s365_s9 = scalar_lea.hbm %s548_s4, 128 }
  0x15   : > { %p366_p2 = scmp.ne.s32.totalorder %s548_s4, %s365_s9  ;;  %p367_p3 = pneg %p552_p13 }
  0x16   : > { %s370_s17 = scalar_lea.hbm %s652_s0, 256  ;;  %p371_p5 = scmp.lt.u32.totalorder %s548_s4, %s652_s0 }
  0x17   : > { %p368_p4 = pnand %p367_p3, %p366_p2  ;;  %p372_p8 = scmp.lt.u32.totalorder %s370_s17, %s365_s9 }
  0x18   : > { %p374_p9 = scmp.lt.u32.totalorder %s365_s9, %s548_s4 }
  0x19   : > { %p369_p7 = pneg %p368_p4  ;;  %p373_p10 = por %p372_p8, %p371_p5 }
  0x1b   : > { %p375_p0 = por %p374_p9, %p373_p10 }
  0x1d   : > { %p376_p1 = pnand %p375_p0, %p369_p7 }
  0x1f   : > { %379 = shalt.err (!%p376_p1)
}
  0x20   : > { %s380_s22 = scalar_lea.vmem %s556_s6, 128  ;;  %s463_s26 = smov [#allocation2]  }
  0x21   : > { %p381_p2 = scmp.ne.s32.totalorder %s556_s6, %s380_s22  ;;  %s385_s27 = sshll.u32 %s463_s26, 4  ;;  %s386_s27 = int_to_ptr.vmem [resolvable:$false] %s385_s27 }
  0x22   : > { %s387_s28 = scalar_lea.vmem %s386_s27, 256  ;;  %p388_p11 = scmp.lt.s32.totalorder %s556_s6, %s386_s27 }
  0x23   : > { %p383_p4 = pnand %p381_p2, %p367_p3  ;;  %p389_p5 = scmp.lt.s32.totalorder %s387_s28, %s380_s22 }
  0x25   : > { %p384_p12 = pneg %p383_p4  ;;  %p390_p8 = por %p389_p5, %p388_p11 }
  0x27   : > { %p391_p9 = pnand %p390_p8, %p384_p12 }
  0x29   : > { %394 = shalt.err (!%p391_p9)
}
  0x2a   : > { %324 = dma.hbm_to_vmem [thread:$0]  (!%p552_p13), %s548_s4, 128, %s556_s6, %s138_s8  }
  0x2b   : > { %p662_p0 = scmp.lt.s32.totalorder %s461_s15, 3  ;;  %p663_p1 = scmp.ge.s32.totalorder %s461_s15, 1 }
  0x2d   : > { %p154_p3 = pnand %p663_p1, %p662_p0 }
  0x2e   : > { %s590_s29 = sand.u32 (!%p154_p3), 1, %s453_s13  }
  0x2f   : > { %157 = sbr.rel (%p154_p3) target bundleno = 241 (0xf1), region = 32  ;;  %s309_s30 = sshll.u32 (!%p154_p3), %s590_s29, 3 }
  0x30   : > { %s160_s5 = scalar_lea.sflag (!%p154_p3), [#allocation3], %s590_s29  ;;  %s163_s9 = scalar_lea.vmem (!%p154_p3), [#allocation2], %s309_s30 }
  0x36   : > { %440 = dma.done.wait (%p528_p6), %s160_s5, 128  }
  0x37   : > { %442 = vsyncadd (%p528_p6), %s160_s5, 4294967168  ;;  %v186_v0 = vld [vmem:[%s163_s9] sm:$0xff]  ;;  %s314_s8 = sshll.u32 %s506_s16, 7  ;;  %s185_s10 = scalar_lea.vmem [#allocation5], %s309_s30 }
  0x38   : > { %187 = vadd.xlane.f32.xlu0 %v186_v0  ;;  %v192_v1 = vmul.f32 %v186_v0, %v186_v0  ;;  %v311_v12 = vld [vmem:[%s653_s1] ss:$0 sm:$0xff]  ;;  %s233_s11 = sshll.u32 %s185_s10, 4  ;;  %s608_s20 = scalar_lea.hbm %s655_s3, %s314_s8  ;;  %s610_s11 = int_to_ptr.vmem [resolvable:$true] %s233_s11 }
  0x39   : > { %v312_v14 = vld [vmem:[%s654_s2] ss:$0 sm:$0xff]  ;;  %s220_s22 = scalar_lea.sflag [#allocation4], %s590_s29  ;;  %s395_s26 = scalar_lea.vmem %s610_s11, 128 }
  0x3a   : > { %p396_p6 = scmp.ne.s32.totalorder %s610_s11, %s395_s26  ;;  %p664_p11 = scmp.ne.s32.totalorder %s659_s24, 0 }
  0x3b   : > { %s464_s16 = smov [#allocation5]  }
  0x3c   : > { %193 = vadd.xlane.f32.xlu0 %v192_v1  ;;  %p397_p12 = pnand %p396_p6, %p664_p11  ;;  %s399_s27 = sshll.u32 %s464_s16, 4  ;;  %s400_s27 = int_to_ptr.vmem [resolvable:$false] %s399_s27 }
  0x3d   : > { %s401_s28 = scalar_lea.vmem %s400_s27, 256  ;;  %p402_p7 = scmp.lt.s32.totalorder %s610_s11, %s400_s27 }
  0x3e   : > { %p398_p13 = pneg %p397_p12  ;;  %p403_p10 = scmp.lt.s32.totalorder %s401_s28, %s395_s26 }
  0x40   : > { %p404_p2 = por %p403_p10, %p402_p7 }
  0x42   : > { %p405_p4 = pnand %p404_p2, %p398_p13 }
  0xc5   : > { %v188_v2 = vpop.xlane.xlu0 %187 }
  0xc6   : > { %v190_v3 = vmul.f32 0.03125, %v188_v2 }
  0xc8   : > { %v196_v5 = vmul.f32 %v190_v3, %v190_v3  ;;  %v191_v10 = vsub.f32 %v186_v0, %v190_v3 }
  0xc9   : > { %v194_v4 = vpop.xlane.xlu0 %193 }
  0xca   : > { %v195_v6 = vmul.f32 0.03125, %v194_v4 }
  0xcc   : > { %v197_v7 = vsub.f32 %v195_v6, %v196_v5 }
  0xce   : > { %v198_v8 = vmax.f32 %v197_v7, 0.0 }
  0xd0   : > { %v199_v9 = vadd.f32 1e-05, %v198_v8 }
  0xd2   : > { %363 = vrsqrt.f32 %v199_v9 }
  0xdc   : > { %v364_v11 = vpop.eup %363 }
  0xdd   : > { %v201_v13 = vmul.f32 %v364_v11, %v191_v10 }
  0xdf   : > { %v209_v15 = vmul.f32 %v311_v12, %v201_v13 }
  0xe1   : > { %v217_v16 = vadd.f32 %v312_v14, %v209_v15 }
  0xe3   : > { %218 = vst [vmem:[%s185_s10] sm:$0xff] %v217_v16 }
  0xe4   : > { %408 = shalt.err (!%p405_p4)
}
  0xe5   : > { %s409_s29 = scalar_lea.hbm %s608_s20, 128  ;;  %s413_s9 = scalar_lea.hbm %s655_s3, 256 }
  0xe6   : > { %p410_p5 = scmp.ne.s32.totalorder %s608_s20, %s409_s29  ;;  %p414_p0 = scmp.lt.u32.totalorder %s608_s20, %s655_s3 }
  0xe7   : > { %p415_p1 = scmp.lt.u32.totalorder %s413_s9, %s409_s29  ;;  %p417_p6 = scmp.lt.u32.totalorder %s409_s29, %s608_s20 }
  0xe8   : > { %p411_p8 = pnand %p410_p5, %p664_p11 }
  0xe9   : > { %p416_p3 = por %p415_p1, %p414_p0 }
  0xea   : > { %p412_p9 = pneg %p411_p8 }
  0xeb   : > { %p418_p12 = por %p417_p6, %p416_p3 }
  0xed   : > { %p419_p13 = pnand %p418_p12, %p412_p9 }
  0xef   : > { %422 = shalt.err (!%p419_p13)
}
  0xf0   : > { %319 = dma.vmem_to_hbm [thread:$0]  (%p664_p11), %s610_s11, 128, %s608_s20, %s220_s22  }
  0xf1 PF: > { %s245_s6 = sand.u32 1, %s449_s12   ;;  %p665_p7 = scmp.ne.s32.totalorder %s660_s25, 0 }
  0xf2   : > { %p666_p10 = scmp.ge.s32.totalorder %s461_s15, 2  ;;  %s246_s7 = scalar_lea.sflag [#allocation4], %s245_s6 }
  0xf4   : > { %p326_p2 = pnand %p666_p10, %p665_p7 }
  0xf6   : > { %444 = dma.done.wait (!%p326_p2), %s246_s7, 128  }
  0xf7   : > { %446 = vsyncadd (!%p326_p2), %s246_s7, 4294967168  ;;  %p16_p4 = scmp.ge.s32.totalorder %s510_s18, 4   ;;  %s667_s12 = smov %s453_s13 }
  0xf8   : > { %s668_s13 = smov %s457_s14  ;;  %s669_s14 = smov %s522_s21 }
  0xf9   : > { %s670_s15 = smov %s510_s18  ;;  %18 = sbr.rel (!%p16_p4) target bundleno = 5 (0x5), region = 77 }
 0x100   :  { %251 = vsyncpa [#allocation3], 1 }
 0x101   :  { %253 = vsyncpa [#allocation3 + $0x1], 1 }
 0x102   :  { %254 = vsyncpa [#allocation4], 1 }
 0x103   :  { %256 = vsyncpa [#allocation4 + $0x1], 1 }

</bundles_post_ra>
